<compile_context>
chip_gen: v6e
topology: v6e:2x2x1
jax: 0.10.0
libtpu: 0.0.40
codegen_flags: <defaults>
</compile_context>

<pallas_src>
import functools
import math

import jax
import jax.numpy as jnp
from jax.experimental import pallas as pl
from jax.experimental.pallas import tpu as pltpu


# ---------------------------------------------------------------------------
# Fast (default) kernel: exact algebraic collapse of the module forward.
#   out[l, n, :] = (value_param[n] @ Wv^T + bv) @ Wo^T + bo      (independent of q, k)
# Output is written as a lane-dense (L, N*E) slab.
# ---------------------------------------------------------------------------
def _collapsed_value_kernel(vparam_ref, wv_ref, bv_ref, wo_ref, bo_ref, o_ref):
    N, E = vparam_ref.shape
    v_proj = jnp.dot(vparam_ref[...].astype(jnp.float32), wv_ref[...],
                     preferred_element_type=jnp.float32) + bv_ref[...]        # (N, E)
    rows = jnp.dot(v_proj, wo_ref[...],
                   preferred_element_type=jnp.float32) + bo_ref[...]          # (N, E)
    # Lay the N per-batch rows out along lanes: (1, N*E), then broadcast over L sublanes.
    flat = jnp.concatenate([rows[n:n + 1, :] for n in range(N)], axis=-1)     # (1, N*E)
    o_ref[...] = jnp.broadcast_to(flat, o_ref.shape).astype(o_ref.dtype)


# ---------------------------------------------------------------------------
# General kernel: full multi-head attention in ONE grid step.
#   q_ref: (L, N*E)  k_ref: (S, N*E)  vparam_ref: (N, E)  o_ref: (L, N*E)
# Weights are pre-transposed to (E_in, E_out); 1/sqrt(Dh) is pre-folded into wq/bq.
# ---------------------------------------------------------------------------
def _full_attention_kernel(q_ref, k_ref, vparam_ref,
                           wq_ref, wk_ref, wv_ref,
                           bq_ref, bk_ref, bv_ref,
                           wo_ref, bo_ref,
                           o_ref, *, num_heads):
    N, E = vparam_ref.shape
    L = q_ref.shape[0]
    S = k_ref.shape[0]
    Dh = E // num_heads

    q_all = q_ref[...].astype(jnp.float32)     # (L, N*E)
    k_all = k_ref[...].astype(jnp.float32)     # (S, N*E)

    wq = wq_ref[...]
    wk = wk_ref[...]
    wo = wo_ref[...]
    bq = bq_ref[...]
    bk = bk_ref[...]
    bo = bo_ref[...]

    # Value projection done once per batch row (never S times).
    v_proj = jnp.dot(vparam_ref[...].astype(jnp.float32), wv_ref[...],
                     preferred_element_type=jnp.float32) + bv_ref[...]        # (N, E)

    outs = []
    for n in range(N):                                   # static, unrolled (N is tiny)
        qn = q_all[:, n * E:(n + 1) * E]                 # (L, E) lane slice — no transpose
        kn = k_all[:, n * E:(n + 1) * E]                 # (S, E)
        qp = jnp.dot(qn, wq, preferred_element_type=jnp.float32) + bq   # scale pre-folded
        kp = jnp.dot(kn, wk, preferred_element_type=jnp.float32) + bk
        vn = jnp.broadcast_to(v_proj[n:n + 1, :], (S, E))               # value rows identical

        heads = []
        for h in range(num_heads):                       # static, unrolled
            lo, hi = h * Dh, (h + 1) * Dh
            s = jax.lax.dot_general(qp[:, lo:hi], kp[:, lo:hi],
                                    (((1,), (1,)), ((), ())),
                                    preferred_element_type=jnp.float32)  # (L, S)
            m = jnp.max(s, axis=-1, keepdims=True)
            p = jnp.exp(s - m)
            p = p / jnp.sum(p, axis=-1, keepdims=True)
            heads.append(jnp.dot(p, vn[:, lo:hi], preferred_element_type=jnp.float32))

        attn = jnp.concatenate(heads, axis=-1)                            # (L, E)
        # Single fused output projection (instead of per-head partial matmuls).
        outs.append(jnp.dot(attn, wo, preferred_element_type=jnp.float32) + bo)

    o_ref[...] = jnp.concatenate(outs, axis=-1).astype(o_ref.dtype)       # (L, N*E)


# ---------------------------------------------------------------------------
# Wrapper
# ---------------------------------------------------------------------------
def cross_modal_attention(query, key, value_param,
                          wq, wk, wv, bq, bk, bv, wo, bo, num_heads,
                          *, exploit_value_broadcast=True):
    """query: (L, N, E), key: (S, N, E) (seq-first, nn.MultiheadAttention default).
    Returns attn_output: (L, N, E)."""
    S, N, E = key.shape
    L = query.shape[0]
    num_latents = value_param.shape[0]
    assert N == num_latents, "module shape-checks only when batch == num_latents"
    assert E % num_heads == 0
    head_dim = E // num_heads
    scale = 1.0 / math.sqrt(head_dim)

    wv_t = wv.T
    wo_t = wo.T
    bv_r = bv.reshape(1, E)
    bo_r = bo.reshape(1, E)

    if exploit_value_broadcast:
        # Exact collapse: output is independent of query/key (value rows are identical
        # within a batch and softmax rows sum to 1). One single-step pallas_call.
        out2 = pl.pallas_call(
            _collapsed_value_kernel,
            out_shape=jax.ShapeDtypeStruct((L, N * E), query.dtype),
            grid=(1,),
            in_specs=[
                pl.BlockSpec((N, E), lambda i: (0, 0)),     # value_param
                pl.BlockSpec((E, E), lambda i: (0, 0)),     # Wv^T
                pl.BlockSpec((1, E), lambda i: (0, 0)),     # bv
                pl.BlockSpec((E, E), lambda i: (0, 0)),     # Wo^T
                pl.BlockSpec((1, E), lambda i: (0, 0)),     # bo
            ],
            out_specs=pl.BlockSpec((L, N * E), lambda i: (0, 0)),
            compiler_params=pltpu.CompilerParams(dimension_semantics=("arbitrary",)),
        )(value_param, wv_t, bv_r, wo_t, bo_r)
        return out2.reshape(L, N, E)

    # General path: full multi-head attention, single grid step, no wrapper transposes
    # (only free contiguous reshapes), no materialized (S, N, E) value broadcast.
    wq_t = wq.T * scale                 # fold 1/sqrt(Dh) into the q projection
    bq_s = (bq * scale).reshape(1, E)
    wk_t = wk.T
    bk_r = bk.reshape(1, E)

    q2 = query.reshape(L, N * E)        # free reshape (contiguous)
    k2 = key.reshape(S, N * E)          # free reshape (contiguous)

    kernel = functools.partial(_full_attention_kernel, num_heads=num_heads)
    out2 = pl.pallas_call(
        kernel,
        out_shape=jax.ShapeDtypeStruct((L, N * E), query.dtype),
        grid=(1,),
        in_specs=[
            pl.BlockSpec((L, N * E), lambda i: (0, 0)),     # q slab
            pl.BlockSpec((S, N * E), lambda i: (0, 0)),     # k slab
            pl.BlockSpec((N, E), lambda i: (0, 0)),         # value_param
            pl.BlockSpec((E, E), lambda i: (0, 0)),         # Wq^T * scale
            pl.BlockSpec((E, E), lambda i: (0, 0)),         # Wk^T
            pl.BlockSpec((E, E), lambda i: (0, 0)),         # Wv^T
            pl.BlockSpec((1, E), lambda i: (0, 0)),         # bq * scale
            pl.BlockSpec((1, E), lambda i: (0, 0)),         # bk
            pl.BlockSpec((1, E), lambda i: (0, 0)),         # bv
            pl.BlockSpec((E, E), lambda i: (0, 0)),         # Wo^T
            pl.BlockSpec((1, E), lambda i: (0, 0)),         # bo
        ],
        out_specs=pl.BlockSpec((L, N * E), lambda i: (0, 0)),
        compiler_params=pltpu.CompilerParams(dimension_semantics=("arbitrary",)),
    )(q2, k2, value_param, wq_t, wk_t, wv_t, bq_s, bk_r, bv_r, wo_t, bo_r)
    return out2.reshape(L, N, E)


# ---------------------------------------------------------------------------
# Pure-JAX reference reproducing nn.MultiheadAttention forward.
# ---------------------------------------------------------------------------
def ref_forward(query, key, value_param, wq, wk, wv, bq, bk, bv, wo, bo, num_heads):
    S, N, E = key.shape
    L = query.shape[0]
    Dh = E // num_heads
    sa_value = jnp.broadcast_to(value_param[None, :, :], (S, value_param.shape[0], E))
    q = query @ wq.T + bq
    k = key @ wk.T + bk
    v = sa_value @ wv.T + bv
    qh = q.reshape(L, N, num_heads, Dh).transpose(1, 2, 0, 3) * (1.0 / math.sqrt(Dh))
    kh = k.reshape(S, N, num_heads, Dh).transpose(1, 2, 0, 3)
    vh = v.reshape(S, N, num_heads, Dh).transpose(1, 2, 0, 3)
    s = jnp.einsum('nhld,nhsd->nhls', qh, kh)
    p = jax.nn.softmax(s, axis=-1)
    o = jnp.einsum('nhls,nhsd->nhld', p, vh)
    o = o.transpose(2, 0, 1, 3).reshape(L, N, E)
    return o @ wo.T + bo


if __name__ == "__main__":
    emb_dim, num_heads, num_latents = 32, 4, 4
    L, S = 16, 8
    N = num_latents  # required by the module's value-repeat semantics

    root = jax.random.PRNGKey(0)
    ks = jax.random.split(root, 8)

    # Deterministic "parameters" (shapes follow the module __init__).
    value_param = jax.random.normal(ks[0], (num_latents, emb_dim), jnp.float32)
    in_proj_w = 0.1 * jax.random.normal(ks[1], (3 * emb_dim, emb_dim), jnp.float32)
    in_proj_b = 0.1 * jax.random.normal(ks[2], (3 * emb_dim,), jnp.float32)
    wo = 0.1 * jax.random.normal(ks[3], (emb_dim, emb_dim), jnp.float32)
    bo = 0.1 * jax.random.normal(ks[4], (emb_dim,), jnp.float32)
    wq, wk, wv = in_proj_w[:emb_dim], in_proj_w[emb_dim:2 * emb_dim], in_proj_w[2 * emb_dim:]
    bq, bk, bv = in_proj_b[:emb_dim], in_proj_b[emb_dim:2 * emb_dim], in_proj_b[2 * emb_dim:]

    # Inputs (seq-first, like nn.MultiheadAttention default).
    query = jax.random.normal(ks[5], (L, N, emb_dim), jnp.float32)
    key_in = jax.random.normal(ks[6], (S, N, emb_dim), jnp.float32)

    # Default optimized path (exact algebraic collapse).
    out_fast = cross_modal_attention(query, key_in, value_param,
                                     wq, wk, wv, bq, bk, bv, wo, bo, num_heads)
    # General full-attention Pallas kernel (single grid step).
    out_full = cross_modal_attention(query, key_in, value_param,
                                     wq, wk, wv, bq, bk, bv, wo, bo, num_heads,
                                     exploit_value_broadcast=False)
    out_fast, out_full = jax.block_until_ready((out_fast, out_full))

    ref = ref_forward(query, key_in, value_param,
                      wq, wk, wv, bq, bk, bv, wo, bo, num_heads)

    assert out_fast.shape == (L, N, emb_dim)
    assert out_full.shape == (L, N, emb_dim)
    assert jnp.allclose(out_fast, ref, atol=5e-5, rtol=5e-5), "fast-path mismatch vs reference"
    assert jnp.allclose(out_full, ref, atol=5e-5, rtol=5e-5), "full-path mismatch vs reference"
    print("KERNEL_OK")
</pallas_src>

<mosaic_0001>
module attributes {stable_mosaic.version = 11 : i64} {
  func.func @_collapsed_value_kernel(%arg0: i32, %arg1: memref<4x32xf32, #tpu.memory_space<vmem>>, %arg2: memref<32x32xf32, #tpu.memory_space<vmem>>, %arg3: memref<1x32xf32, #tpu.memory_space<vmem>>, %arg4: memref<32x32xf32, #tpu.memory_space<vmem>>, %arg5: memref<1x32xf32, #tpu.memory_space<vmem>>, %arg6: memref<16x128xf32, #tpu.memory_space<vmem>>) attributes {dimension_semantics = [#tpu.dimension_semantics<arbitrary>], iteration_bounds = array<i64: 1>, scalar_prefetch = 0 : i64, scratch_operands = 0 : i64, tpu.core_type = #tpu.core_type<tc>, window_params = [{pipeline_mode = #tpu.pipeline_mode<synchronous>, transform_indices = @transform_0, window_bounds = array<i64: 4, 32>}, {pipeline_mode = #tpu.pipeline_mode<synchronous>, transform_indices = @transform_1, window_bounds = array<i64: 32, 32>}, {pipeline_mode = #tpu.pipeline_mode<synchronous>, transform_indices = @transform_2, window_bounds = array<i64: 1, 32>}, {pipeline_mode = #tpu.pipeline_mode<synchronous>, transform_indices = @transform_3, window_bounds = array<i64: 32, 32>}, {pipeline_mode = #tpu.pipeline_mode<synchronous>, transform_indices = @transform_4, window_bounds = array<i64: 1, 32>}, {pipeline_mode = #tpu.pipeline_mode<synchronous>, transform_indices = @transform_5, window_bounds = array<i64: 16, 128>}]} {
    %c0 = arith.constant 0 : index
    %c0_0 = arith.constant 0 : index
    %0 = vector.load %arg1[%c0, %c0_0] : memref<4x32xf32, #tpu.memory_space<vmem>>, vector<4x32xf32>
    %c0_1 = arith.constant 0 : index
    %c0_2 = arith.constant 0 : index
    %1 = vector.load %arg2[%c0_1, %c0_2] : memref<32x32xf32, #tpu.memory_space<vmem>>, vector<32x32xf32>
    %cst = arith.constant dense<0.000000e+00> : vector<4x32xf32>
    %2 = tpu.matmul %0, %1, %cst {dimension_numbers = #tpu.dot_dimension_numbers<[1], [0], [0], [1], [0, 0, 1, 1], [], []>} : vector<4x32xf32>, vector<32x32xf32>, vector<4x32xf32> -> vector<4x32xf32>
    %c0_3 = arith.constant 0 : index
    %c0_4 = arith.constant 0 : index
    %3 = vector.load %arg3[%c0_3, %c0_4] : memref<1x32xf32, #tpu.memory_space<vmem>>, vector<1x32xf32>
    %4 = vector.broadcast %3 : vector<1x32xf32> to vector<4x32xf32>
    %5 = arith.addf %2, %4 : vector<4x32xf32>
    %c0_5 = arith.constant 0 : index
    %c0_6 = arith.constant 0 : index
    %6 = vector.load %arg4[%c0_5, %c0_6] : memref<32x32xf32, #tpu.memory_space<vmem>>, vector<32x32xf32>
    %cst_7 = arith.constant dense<0.000000e+00> : vector<4x32xf32>
    %7 = tpu.matmul %5, %6, %cst_7 {dimension_numbers = #tpu.dot_dimension_numbers<[1], [0], [0], [1], [0, 0, 1, 1], [], []>} : vector<4x32xf32>, vector<32x32xf32>, vector<4x32xf32> -> vector<4x32xf32>
    %c0_8 = arith.constant 0 : index
    %c0_9 = arith.constant 0 : index
    %8 = vector.load %arg5[%c0_8, %c0_9] : memref<1x32xf32, #tpu.memory_space<vmem>>, vector<1x32xf32>
    %9 = vector.broadcast %8 : vector<1x32xf32> to vector<4x32xf32>
    %10 = arith.addf %7, %9 : vector<4x32xf32>
    %11 = vector.extract_strided_slice %10 {offsets = [0, 0], sizes = [1, 32], strides = [1, 1]} : vector<4x32xf32> to vector<1x32xf32>
    %12 = vector.extract_strided_slice %10 {offsets = [1, 0], sizes = [1, 32], strides = [1, 1]} : vector<4x32xf32> to vector<1x32xf32>
    %13 = vector.extract_strided_slice %10 {offsets = [2, 0], sizes = [1, 32], strides = [1, 1]} : vector<4x32xf32> to vector<1x32xf32>
    %14 = vector.extract_strided_slice %10 {offsets = [3, 0], sizes = [1, 32], strides = [1, 1]} : vector<4x32xf32> to vector<1x32xf32>
    %15 = tpu.concatenate %11, %12, %13, %14 in 1 : vector<1x32xf32>, vector<1x32xf32>, vector<1x32xf32>, vector<1x32xf32> -> vector<1x128xf32>
    %16 = vector.shape_cast %15 : vector<1x128xf32> to vector<1x128xf32>
    %17 = vector.broadcast %16 : vector<1x128xf32> to vector<16x128xf32>
    %c0_10 = arith.constant 0 : index
    %c0_11 = arith.constant 0 : index
    %18 = vector.load %arg6[%c0_10, %c0_11] : memref<16x128xf32, #tpu.memory_space<vmem>>, vector<16x128xf32>
    tpu.vector_store %arg6[%c0_10, %c0_11], %17 {strides = array<i32>} : memref<16x128xf32, #tpu.memory_space<vmem>>, vector<16x128xf32>,
    return
  }
  func.func @transform_0(%arg0: i32) -> (i32, i32) {
    %c0_i32 = arith.constant 0 : i32
    %c0_i32_0 = arith.constant 0 : i32
    %c0_i32_1 = arith.constant 0 : i32
    return %c0_i32, %c0_i32_0 : i32, i32
  }
  func.func @transform_1(%arg0: i32) -> (i32, i32) {
    %c0_i32 = arith.constant 0 : i32
    %c0_i32_0 = arith.constant 0 : i32
    %c0_i32_1 = arith.constant 0 : i32
    return %c0_i32, %c0_i32_0 : i32, i32
  }
  func.func @transform_2(%arg0: i32) -> (i32, i32) {
    %c0_i32 = arith.constant 0 : i32
    %c0_i32_0 = arith.constant 0 : i32
    %c0_i32_1 = arith.constant 0 : i32
    return %c0_i32, %c0_i32_0 : i32, i32
  }
  func.func @transform_3(%arg0: i32) -> (i32, i32) {
    %c0_i32 = arith.constant 0 : i32
    %c0_i32_0 = arith.constant 0 : i32
    %c0_i32_1 = arith.constant 0 : i32
    return %c0_i32, %c0_i32_0 : i32, i32
  }
  func.func @transform_4(%arg0: i32) -> (i32, i32) {
    %c0_i32 = arith.constant 0 : i32
    %c0_i32_0 = arith.constant 0 : i32
    %c0_i32_1 = arith.constant 0 : i32
    return %c0_i32, %c0_i32_0 : i32, i32
  }
  func.func @transform_5(%arg0: i32) -> (i32, i32) {
    %c0_i32 = arith.constant 0 : i32
    %c0_i32_0 = arith.constant 0 : i32
    %c0_i32_1 = arith.constant 0 : i32
    return %c0_i32, %c0_i32_0 : i32, i32
  }
}

</mosaic_0001>

<bundles_post_ra>
// kernel: tpu_custom_call.1
= control target key start
LH: loop header
LB: loop body
LE: loop exit
PB: predicated region body
PF: predicated region fallthrough
CT: control target
= control target key end

     0   :  { %10 = vsyncpa [#allocation3], 0  ;;  %s476_s0 = inlined_call_operand.hbm [shape: f32[4,32], index: 0, kind: input, shape index: {}]   ;;  %s477_s1 = inlined_call_operand.hbm [shape: f32[32,32], index: 1, kind: input, shape index: {}]   ;;  %s478_s2 = inlined_call_operand.vmem [shape: f32[1,32], index: 2, kind: input, shape index: {}]   ;;  %s479_s3 = inlined_call_operand.hbm [shape: f32[32,32], index: 3, kind: input, shape index: {}]   ;;  %s480_s4 = inlined_call_operand.vmem [shape: f32[1,32], index: 4, kind: input, shape index: {}]   ;;  %s481_s5 = inlined_call_operand.hbm [shape: f32[16,128], index: 5, kind: output, shape index: {}]  }
   0x1   :  { %11 = vsyncpa [#allocation6], 0 }
   0x2   :  { %12 = vsyncpa [#allocation4], 0  ;;  %s405_s18 = smov [#allocation5]  }
   0x3   :  { %s28_s19 = sshll.u32 %s405_s18, 4  ;;  %s29_s19 = int_to_ptr.vmem [resolvable:$true] %s28_s19 }
   0x4   :  { %s327_s20 = scalar_lea.vmem %s29_s19, 512  ;;  %p332_p1 = scmp.lt.s32.totalorder %s29_s19, %s29_s19 }
   0x5   :  { %p328_p0 = scmp.ne.s32.totalorder %s29_s19, %s327_s20  ;;  %p333_p2 = scmp.lt.s32.totalorder %s327_s20, %s327_s20 }
   0x7   :  { %p334_p3 = por %p333_p2, %p332_p1 }
   0x9   :  { %p335_p4 = pnand %p334_p3, %p328_p0 }
   0xb   :  { %338 = shalt.err (!%p335_p4)
}
   0xc   :  { %s406_s21 = smov 128   ;;  %s407_s22 = smov 8  }
   0xd   :  { %34 = dma.hbm_to_vmem [thread:$0]  %s477_s1, 512, %s29_s19, [#allocation6], %s406_s21, %s406_s21, %s407_s22  }
   0xe   :  { %s408_s25 = smov [#allocation2]   ;;  %s409_s27 = smov [#allocation7]  }
   0xf   :  { %s19_s26 = sshll.u32 %s408_s25, 4  ;;  %s42_s28 = sshll.u32 %s409_s27, 4  ;;  %s20_s26 = int_to_ptr.vmem [resolvable:$true] %s19_s26  ;;  %s43_s28 = int_to_ptr.vmem [resolvable:$true] %s42_s28 }
  0x10   :  { %s347_s29 = scalar_lea.vmem %s20_s26, 64  ;;  %p352_p6 = scmp.lt.s32.totalorder %s20_s26, %s20_s26 }
  0x11   :  { %p348_p5 = scmp.ne.s32.totalorder %s20_s26, %s347_s29  ;;  %p353_p7 = scmp.lt.s32.totalorder %s347_s29, %s347_s29 }
  0x13   :  { %p354_p8 = por %p353_p7, %p352_p6 }
  0x15   :  { %p355_p9 = pnand %p354_p8, %p348_p5 }
  0x17   :  { %358 = shalt.err (!%p355_p9)
}
  0x18   :  { %22 = dma.hbm_to_vmem [thread:$0]  %s476_s0, 64, %s20_s26, [#allocation3]  }
  0x19   :  { %s367_s7 = scalar_lea.vmem %s43_s28, 512  ;;  %p372_p11 = scmp.lt.s32.totalorder %s43_s28, %s43_s28 }
  0x1a   :  { %p368_p10 = scmp.ne.s32.totalorder %s43_s28, %s367_s7  ;;  %p373_p12 = scmp.lt.s32.totalorder %s367_s7, %s367_s7 }
  0x1c   :  { %p374_p13 = por %p373_p12, %p372_p11 }
  0x1e   :  { %p375_p0 = pnand %p374_p13, %p368_p10 }
  0x20   :  { %378 = shalt.err (!%p375_p0)
}
  0x21   :  { %48 = dma.hbm_to_vmem [thread:$0]  %s479_s3, 512, %s43_s28, [#allocation6], %s406_s21, %s406_s21, %s407_s22  }
  0x22   :  { %399 = dma.done.wait [#allocation3], 64  }
  0x23   :  { %400 = vsyncadd [#allocation3], 4294967232 }
  0x24   :  { %401 = dma.done.wait [#allocation6], 1024  }
  0x25   :  { %402 = vsyncadd [#allocation6], 4294966272  ;;  %v410_v0 = vmov 0.0   ;;  %vm411_vm0 = vmmov 0   ;;  %v64_v1 = vld [vmem:[#allocation5 + $0x18] sm:$0xff]  ;;  %v63_v2 = vld [vmem:[#allocation5 + $0x10] sm:$0xff]  ;;  %v248_v21 = vlaneseq }
  0x26   :  { %286 = vmatprep.subr.mxu0 %v410_v0  ;;  %294 = vmatprep.mubr.msk.f32.mxu0 %vm411_vm0, %v410_v0  ;;  %v149_v3 = vld [vmem:[#allocation7 + $0x18] sm:$0xff]  ;;  %v62_v4 = vld [vmem:[#allocation5 + $0x8] sm:$0xff]  ;;  %v148_v5 = vld [vmem:[#allocation7 + $0x10] sm:$0xff]  ;;  %vm72_vm1 = vcmask 261120   ;;  %s412_s11 = smov 96   ;;  %s413_s12 = smov 32  }
  0x27   :  { %297 = vmatprep.subr.mxu1 %v410_v0  ;;  %305 = vmatprep.mubr.msk.f32.mxu1 %vm411_vm0, %v410_v0  ;;  %v61_v6 = vld [vmem:[#allocation5] sm:$0xff]  ;;  %v60_v7 = vld [vmem:[#allocation2] sm:$0xf]  ;;  %v147_v8 = vld [vmem:[#allocation7 + $0x8] sm:$0xff]  ;;  %v249_v22 = vshrl.u32 %v248_v21, 7  ;;  %vm244_vm2 = vcmask 523264  }
  0x28   :  { %287 = vmatpush3.msra.mxu0 %v64_v1  ;;  %298 = vmatpush3.msra.mxu1 %v149_v3  ;;  %v146_v9 = vld [vmem:[#allocation7] sm:$0xff]  ;;  %v272_v10 = vld [vmem:[%s478_s2] ss:$0 sm:$0xff]  ;;  %s414_s2 = smov 64   ;;  %vm246_vm3 = vcmask 785408  }
  0x29   :  { %288 = vmatprep.subr.mxu0 %v410_v0  ;;  %299 = vmatprep.subr.mxu1 %v410_v0  ;;  %v274_v14 = vld [vmem:[%s480_s4] ss:$0 sm:$0xff]  ;;  %v250_v24 = vsub.s32 0, %v249_v22  ;;  %s415_s4 = smov [#allocation8]  }
  0x2a   :  { %289 = vmatpush3.msra.mxu0 %v63_v2  ;;  %300 = vmatpush3.msra.mxu1 %v148_v5  ;;  %s259_s13 = sshll.u32 %s415_s4, 4  ;;  %s260_s13 = int_to_ptr.vmem [resolvable:$true] %s259_s13 }
  0x2b   :  { %290 = vmatprep.subr.mxu0 %v410_v0  ;;  %301 = vmatprep.subr.mxu1 %v410_v0  ;;  %s379_s14 = scalar_lea.vmem %s260_s13, 256  ;;  %p384_p2 = scmp.lt.s32.totalorder %s260_s13, %s260_s13 }
  0x2c   :  { %291 = vmatpush3.msra.mxu0 %v62_v4  ;;  %302 = vmatpush3.msra.mxu1 %v147_v8  ;;  %p380_p1 = scmp.ne.s32.totalorder %s260_s13, %s379_s14  ;;  %p385_p3 = scmp.lt.s32.totalorder %s379_s14, %s379_s14 }
  0x2d   :  { %292 = vmatprep.subr.mxu0 %v410_v0  ;;  %303 = vmatprep.subr.mxu1 %v410_v0 }
  0x2e   :  { %293 = vmatpush3.msra.mxu0 %v61_v6  ;;  %304 = vmatpush3.msra.mxu1 %v146_v9  ;;  %p386_p4 = por %p385_p3, %p384_p2 }
  0x2f   :  { %295 = vmatmul.mubr.msk.f32.vlgmr.msra.gmra.mxu0 %vm72_vm1, %v60_v7 }
  0x30   :  { %p387_p5 = pnand %p386_p4, %p380_p1 }
  0xef   :  { %v142_v11 = vpop.f32.mrf.mxu0 }
  0xf0   :  { %v143_v12 = vadd.f32 %v272_v10, %v142_v11 }
  0xf1   :  { %v296_v13 = vpop.f32.mrf.mxu0 }
  0xf2   :  { %306 = vmatmul.mubr.msk.f32.vlgmr.msra.gmra.mxu1 %vm72_vm1, %v143_v12 }
 0x1b2   :  { %v226_v15 = vpop.f32.mrf.mxu1 }
 0x1b3   :  { %v227_v16 = vadd.f32 %v274_v14, %v226_v15 }
 0x1b4   :  { %v307_v17 = vpop.f32.mrf.mxu1 }
 0x1b5   :  { %v239_v18 = vrot.slane %v227_v16, 3  ;;  %v231_v19 = vrot.slane %v227_v16, 1  ;;  %v235_v20 = vrot.slane %v227_v16, 2 }
 0x1b7   :  { %240 = vrot.lane.b32.xlu1 %v239_v18, %s412_s11  ;;  %232 = vrot.lane.b32.xlu0 %v231_v19, %s413_s12 }
 0x1bb   :  { %236 = vrot.lane.b32.xlu0 %v235_v20, %s414_s2 }
 0x229   :  { %v233_v23 = vpop.permute.xlu0 %232  ;;  %v241_v27 = vpop.permute.xlu1 %240 }
 0x22a   :  { %v243_v25 = vsel %vm72_vm1, %v227_v16, %v233_v23 }
 0x22d   :  { %v237_v26 = vpop.permute.xlu0 %236 }
 0x22e   :  { %v245_v28 = vsel %vm244_vm2, %v243_v25, %v237_v26 }
 0x22f   :  { %v247_v29 = vsel %vm246_vm3, %v245_v28, %v241_v27 }
 0x230   :  { %v251_v30 = vrot.slane %v247_v29, %v250_v24 }
 0x232   :  { %252 = vst [vmem:[#allocation8] sm:$0xff] %v251_v30  ;;  %253 = vst [vmem:[#allocation8 + $0x8] sm:$0xff] %v251_v30 }
 0x233   :  { %390 = shalt.err (!%p387_p5)
}
 0x234   :  { %265 = dma.vmem_to_hbm [thread:$0]  %s260_s13, 256, %s481_s5, [#allocation4], %s406_s21, %s406_s21, %s407_s22  }
 0x235   :  { %403 = dma.done.wait [#allocation4], 256  }
 0x236   :  { %404 = vsyncadd [#allocation4], 4294967040 }
 0x237   :  { %269 = vsyncpa [#allocation3], 1 }
 0x238   :  { %270 = vsyncpa [#allocation6], 1 }
 0x239   :  { %271 = vsyncpa [#allocation4], 1 }

</bundles_post_ra>
